<compile_context>
chip_gen: v7x
topology: tpu7x:2x2x1
jax: 0.10.0
libtpu: 0.0.40
codegen_flags: <defaults>
</compile_context>

<pallas_src>
import functools
import math

import jax
import jax.numpy as jnp
from jax.experimental import pallas as pl
from jax.experimental.pallas import tpu as pltpu


def _round_up(a, b):
    return ((a + b - 1) // b) * b


# ------------- fused kernel, order A: out += G[:,k] @ (x_aug[k] @ W_aug) -----
def _fused_g_xw_kernel(g_ref, x_ref, w_ref, o_ref, acc_ref, *, precision):
    k = pl.program_id(1)

    @pl.when(k == 0)
    def _():
        acc_ref[...] = jnp.zeros_like(acc_ref)

    # Recompute this K-tile's slice of (x @ W + b) on the fly; W_aug stays
    # VMEM-resident, so this costs a few MXU flops but zero extra HBM traffic.
    xw = jnp.dot(x_ref[...], w_ref[...],
                 preferred_element_type=jnp.float32, precision=precision)
    acc_ref[...] += jnp.dot(g_ref[...], xw,
                            preferred_element_type=jnp.float32,
                            precision=precision)

    @pl.when(k == pl.num_programs(1) - 1)
    def _():
        o_ref[...] = acc_ref[...].astype(o_ref.dtype)


# ------------- fused kernel, order B: out = (G @ x_aug) @ W_aug --------------
def _fused_gx_w_kernel(g_ref, x_ref, w_ref, o_ref, acc_ref, *, precision):
    k = pl.program_id(1)

    @pl.when(k == 0)
    def _():
        acc_ref[...] = jnp.zeros_like(acc_ref)

    acc_ref[...] += jnp.dot(g_ref[...], x_ref[...],
                            preferred_element_type=jnp.float32,
                            precision=precision)

    @pl.when(k == pl.num_programs(1) - 1)
    def _():
        o_ref[...] = jnp.dot(acc_ref[...], w_ref[...],
                             preferred_element_type=jnp.float32,
                             precision=precision).astype(o_ref.dtype)


def _vmem_budget_bytes():
    """~80% of per-core VMEM (falls back to v7x's smaller 64 MiB budget)."""
    try:
        cap = pltpu.get_tpu_info().vmem_capacity_bytes
    except Exception:
        cap = 64 * 1024 * 1024
    return min(int(cap * 0.8), 100 * 1024 * 1024)


def _pick_tiles(n_pad, in_aug, out_pad, g_bytes, x_bytes, w_bytes, o_bytes,
                acc_cols, budget, max_tile=2048):
    """Largest (tm, tk) multiples of 128 dividing n_pad that fit the budget.

    tm is maximised first (x_aug re-read traffic scales as n_pad/tm), then tk
    (fewer K steps -> less per-step overhead).  tm is capped at n_pad//2 when
    possible so the 'parallel' row axis has >= 2 steps (v7x megacore).
    """
    cap = n_pad if n_pad < 256 else n_pad // 2
    cap = min(cap, max_tile)
    cands = sorted((t for t in range(128, cap + 1, 128) if n_pad % t == 0),
                   reverse=True)
    if not cands:
        cands = [128]
    w_resident = 2 * in_aug * out_pad * w_bytes          # counted double-buffered
    for tm in cands:
        for tk in cands:
            need = (2 * tm * tk * g_bytes                # streamed G tiles
                    + 2 * tk * in_aug * x_bytes          # streamed x_aug tiles
                    + w_resident
                    + 2 * tm * out_pad * o_bytes         # output tiles
                    + tm * acc_cols * 4)                 # f32 accumulator
            if need <= budget:
                return tm, tk
    return cands[-1], cands[-1]


def hgnn_conv_forward(x, G, weight, bias=None, *, compute_dtype=None,
                      precision=None):
    """HGNN_conv forward: (N, out_ft) = G @ (x @ weight + bias).

    x: (N, in_ft); G: (N, N); weight: (in_ft, out_ft); bias: (out_ft,) or None.
    compute_dtype (e.g. jnp.bfloat16) casts only x / weight / bias — never the
    O(N^2) G (wrapper-side G casts are a net HBM-traffic loss).
    """
    n, in_ft = x.shape
    assert G.shape == (n, n)
    out_ft = weight.shape[1]
    out_dtype = x.dtype

    n_pad = _round_up(n, 128)         # lane alignment only, NOT a tile multiple
    out_pad = _round_up(out_ft, 128)  # lane-dense output stores / MXU columns

    # Fold bias into the matmul: x_aug = [x | 1], W_aug = [[W], [b]], so
    # x_aug @ W_aug == x @ W + b.  Padded x_aug rows are all-zero, so no bias
    # leaks into padded rows, and padded G columns are zero anyway.
    b_row = bias if bias is not None else jnp.zeros((out_ft,), weight.dtype)
    x_aug = jnp.concatenate([x, jnp.ones((n, 1), x.dtype)], axis=1)
    w_aug = jnp.concatenate(
        [weight, b_row.reshape(1, out_ft).astype(weight.dtype)], axis=0)
    in_aug = in_ft + 1

    if n_pad != n:                    # skip the O(N^2) pad copy when aligned
        x_aug = jnp.pad(x_aug, ((0, n_pad - n), (0, 0)))
        G = jnp.pad(G, ((0, n_pad - n), (0, n_pad - n)))
    w_aug = jnp.pad(w_aug, ((0, 0), (0, out_pad - out_ft)))

    if compute_dtype is not None:
        x_aug = x_aug.astype(compute_dtype)   # small operands only; G untouched
        w_aug = w_aug.astype(compute_dtype)

    # Contract the N^2 matmul over the narrower feature dim:
    #   in_aug <= out_pad -> out = (G @ x_aug) @ W_aug   (acc width in_aug)
    #   otherwise         -> out = G @ (x_aug @ W_aug)   (acc width out_pad)
    reorder = in_aug <= out_pad
    acc_cols = in_aug if reorder else out_pad
    body = _fused_gx_w_kernel if reorder else _fused_g_xw_kernel
    kernel = functools.partial(body, precision=precision)

    budget = _vmem_budget_bytes()
    tm, tk = _pick_tiles(
        n_pad, in_aug, out_pad,
        jnp.dtype(G.dtype).itemsize, jnp.dtype(x_aug.dtype).itemsize,
        jnp.dtype(w_aug.dtype).itemsize, jnp.dtype(out_dtype).itemsize,
        acc_cols, budget)

    # TODO(synk): add an output-column grid axis when the resident W_aug block
    # (in_aug * out_pad) alone no longer fits the per-chip VMEM budget.
    out = pl.pallas_call(
        kernel,
        out_shape=jax.ShapeDtypeStruct((n_pad, out_pad), out_dtype),
        grid=(n_pad // tm, n_pad // tk),
        in_specs=[
            pl.BlockSpec((tm, tk), lambda i, k: (i, k)),           # G, read once
            pl.BlockSpec((tk, in_aug), lambda i, k: (k, 0)),       # x_aug per K tile
            pl.BlockSpec((in_aug, out_pad), lambda i, k: (0, 0)),  # W_aug resident
        ],
        out_specs=pl.BlockSpec((tm, out_pad), lambda i, k: (i, 0)),
        scratch_shapes=[pltpu.VMEM((tm, acc_cols), jnp.float32)],
        compiler_params=pltpu.CompilerParams(
            dimension_semantics=("parallel", "arbitrary"),
            vmem_limit_bytes=budget),
    )(G, x_aug, w_aug)

    return out[:n, :out_ft]


def init_hgnn_conv_params(key, in_ft, out_ft, dtype=jnp.float32):
    """Mirror HGNN_conv.reset_parameters: uniform(-stdv, stdv), stdv=1/sqrt(out_ft)."""
    kw, kb = jax.random.split(key)
    stdv = 1.0 / math.sqrt(out_ft)
    weight = jax.random.uniform(kw, (in_ft, out_ft), dtype, -stdv, stdv)
    bias = jax.random.uniform(kb, (out_ft,), dtype, -stdv, stdv)
    return weight, bias


def _ref_forward(x, G, weight, bias):
    hp = jax.lax.Precision.HIGHEST
    xw = jnp.dot(x, weight, precision=hp)
    if bias is not None:
        xw = xw + bias
    return jnp.dot(G, xw, precision=hp)


if __name__ == "__main__":
    key = jax.random.PRNGKey(0)

    # Inputs quantized to bf16-representable values so the check is insensitive
    # to how many bf16 passes the MXU uses internally for f32 matmuls.
    q = lambda a: a.astype(jnp.bfloat16).astype(jnp.float32)

    # (N, in_ft, out_ft, use_bias): exercises both kernel orderings, the
    # K-axis accumulator over multiple tiles, ragged-N padding, and bias=None.
    cases = [(8, 32, 16, True),      # reordered (G@x)@W path, single tile
             (200, 160, 16, True),   # fused G@(xW+b) path, 2x2 grid, padded N
             (8, 32, 16, False)]     # no bias

    for idx, (N, in_ft, out_ft, use_bias) in enumerate(cases):
        k_x, k_g, k_p = jax.random.split(jax.random.fold_in(key, idx), 3)
        x = q(jax.random.normal(k_x, (N, in_ft), dtype=jnp.float32))
        G = q(jax.random.normal(k_g, (N, N), dtype=jnp.float32))
        weight, bias = init_hgnn_conv_params(k_p, in_ft, out_ft)
        weight, bias = q(weight), q(bias)
        if not use_bias:
            bias = None

        out = jax.block_until_ready(hgnn_conv_forward(x, G, weight, bias))
        ref = _ref_forward(x, G, weight, bias)

        assert out.shape == (N, out_ft)
        err = float(jnp.max(jnp.abs(out - ref)))
        scale = float(jnp.max(jnp.abs(ref)))
        assert err <= 2e-2 * max(1.0, scale), (idx, err, scale)

    print("KERNEL_OK")
</pallas_src>

<mosaic_0001>
module attributes {stable_mosaic.version = 11 : i64} {
  func.func @_fused_gx_w_kernel(%arg0: i32, %arg1: i32, %arg2: memref<128x128xf32, #tpu.memory_space<vmem>>, %arg3: memref<128x33xf32, #tpu.memory_space<vmem>>, %arg4: memref<33x128xf32, #tpu.memory_space<vmem>>, %arg5: memref<128x128xf32, #tpu.memory_space<vmem>>, %arg6: memref<128x33xf32, #tpu.memory_space<vmem>>) attributes {dimension_semantics = [#tpu.dimension_semantics<parallel>, #tpu.dimension_semantics<arbitrary>], iteration_bounds = array<i64: 1, 1>, scalar_prefetch = 0 : i64, scratch_operands = 1 : i64, tpu.core_type = #tpu.core_type<tc>, window_params = [{transform_indices = @transform_0, window_bounds = array<i64: 128, 128>}, {transform_indices = @transform_1, window_bounds = array<i64: 128, 33>}, {pipeline_mode = #tpu.pipeline_mode<synchronous>, transform_indices = @transform_2, window_bounds = array<i64: 33, 128>}, {transform_indices = @transform_3, window_bounds = array<i64: 128, 128>}]} {
    %c0_i32 = arith.constant 0 : i32
    %0 = arith.cmpi eq, %arg1, %c0_i32 : i32
    %1 = arith.extui %0 : i1 to i32
    %c0_i32_0 = arith.constant 0 : i32
    %2 = arith.cmpi ne, %1, %c0_i32_0 : i32
    scf.if %2 {
      %cst_10 = arith.constant 0.000000e+00 : f32
      %12 = vector.broadcast %cst_10 : f32 to vector<128x33xf32>
      %c0_11 = arith.constant 0 : index
      %c0_12 = arith.constant 0 : index
      %13 = vector.load %arg6[%c0_11, %c0_12] : memref<128x33xf32, #tpu.memory_space<vmem>>, vector<128x33xf32>
      tpu.vector_store %arg6[%c0_11, %c0_12], %12 {strides = array<i32>} : memref<128x33xf32, #tpu.memory_space<vmem>>, vector<128x33xf32>,
    } else {
    }
    %c0 = arith.constant 0 : index
    %c0_1 = arith.constant 0 : index
    %3 = vector.load %arg6[%c0, %c0_1] : memref<128x33xf32, #tpu.memory_space<vmem>>, vector<128x33xf32>
    %c0_2 = arith.constant 0 : index
    %c0_3 = arith.constant 0 : index
    %4 = vector.load %arg2[%c0_2, %c0_3] : memref<128x128xf32, #tpu.memory_space<vmem>>, vector<128x128xf32>
    %c0_4 = arith.constant 0 : index
    %c0_5 = arith.constant 0 : index
    %5 = vector.load %arg3[%c0_4, %c0_5] : memref<128x33xf32, #tpu.memory_space<vmem>>, vector<128x33xf32>
    %cst = arith.constant dense<0.000000e+00> : vector<128x33xf32>
    %6 = tpu.matmul %4, %5, %cst {dimension_numbers = #tpu.dot_dimension_numbers<[1], [0], [0], [1], [0, 0, 1, 1], [], []>} : vector<128x128xf32>, vector<128x33xf32>, vector<128x33xf32> -> vector<128x33xf32>
    %7 = arith.addf %3, %6 : vector<128x33xf32>
    %c0_6 = arith.constant 0 : index
    %c0_7 = arith.constant 0 : index
    %8 = vector.load %arg6[%c0_6, %c0_7] : memref<128x33xf32, #tpu.memory_space<vmem>>, vector<128x33xf32>
    tpu.vector_store %arg6[%c0_6, %c0_7], %7 {strides = array<i32>} : memref<128x33xf32, #tpu.memory_space<vmem>>, vector<128x33xf32>,
    %c0_i32_8 = arith.constant 0 : i32
    %9 = arith.cmpi eq, %arg1, %c0_i32_8 : i32
    %10 = arith.extui %9 : i1 to i32
    %c0_i32_9 = arith.constant 0 : i32
    %11 = arith.cmpi ne, %10, %c0_i32_9 : i32
    scf.if %11 {
      %c0_10 = arith.constant 0 : index
      %c0_11 = arith.constant 0 : index
      %12 = vector.load %arg6[%c0_10, %c0_11] : memref<128x33xf32, #tpu.memory_space<vmem>>, vector<128x33xf32>
      %c0_12 = arith.constant 0 : index
      %c0_13 = arith.constant 0 : index
      %13 = vector.load %arg4[%c0_12, %c0_13] : memref<33x128xf32, #tpu.memory_space<vmem>>, vector<33x128xf32>
      %cst_14 = arith.constant dense<0.000000e+00> : vector<128x128xf32>
      %14 = tpu.matmul %12, %13, %cst_14 {dimension_numbers = #tpu.dot_dimension_numbers<[1], [0], [0], [1], [0, 0, 1, 1], [], []>} : vector<128x33xf32>, vector<33x128xf32>, vector<128x128xf32> -> vector<128x128xf32>
      %c0_15 = arith.constant 0 : index
      %c0_16 = arith.constant 0 : index
      %15 = vector.load %arg5[%c0_15, %c0_16] : memref<128x128xf32, #tpu.memory_space<vmem>>, vector<128x128xf32>
      tpu.vector_store %arg5[%c0_15, %c0_16], %14 {strides = array<i32>} : memref<128x128xf32, #tpu.memory_space<vmem>>, vector<128x128xf32>,
    } else {
    }
    return
  }
  func.func @transform_0(%arg0: i32, %arg1: i32) -> (i32, i32) {
    %c0_i32 = arith.constant 0 : i32
    return %arg0, %arg1 : i32, i32
  }
  func.func @transform_1(%arg0: i32, %arg1: i32) -> (i32, i32) {
    %c0_i32 = arith.constant 0 : i32
    %c0_i32_0 = arith.constant 0 : i32
    return %arg1, %c0_i32 : i32, i32
  }
  func.func @transform_2(%arg0: i32, %arg1: i32) -> (i32, i32) {
    %c0_i32 = arith.constant 0 : i32
    %c0_i32_0 = arith.constant 0 : i32
    %c0_i32_1 = arith.constant 0 : i32
    return %c0_i32, %c0_i32_0 : i32, i32
  }
  func.func @transform_3(%arg0: i32, %arg1: i32) -> (i32, i32) {
    %c0_i32 = arith.constant 0 : i32
    %c0_i32_0 = arith.constant 0 : i32
    return %arg0, %c0_i32 : i32, i32
  }
}

</mosaic_0001>

<bundles_post_ra>
// kernel: tpu_custom_call.1
= control target key start
LH: loop header
LB: loop body
LE: loop exit
PB: predicated region body
PF: predicated region fallthrough
CT: control target
= control target key end

     0   :  { %vm19_vm0 = vcmask 269312   ;;  %v743_v5 = vmov 0.0   ;;  %s938_s0 = inlined_call_operand.vmem [shape: f32[128,128], index: 0, kind: input, shape index: {}]   ;;  %s939_s1 = inlined_call_operand.vmem [shape: f32[128,33], index: 1, kind: input, shape index: {}]   ;;  %s940_s2 = inlined_call_operand.vmem [shape: f32[33,128], index: 2, kind: input, shape index: {}]   ;;  %s941_s3 = inlined_call_operand.hbm [shape: f32[128,128], index: 3, kind: output, shape index: {}]  }
   0x1   :  { %v68_v0 = vld [vmem:[%s939_s1] sm:$0xff]  ;;  %v69_v1 = vld [vmem:[%s939_s1 + $0x8] sm:$0xff]  ;;  %v70_v2 = vld [vmem:[%s939_s1 + $0x10] sm:$0xff]  ;;  %21 = vst.msk [vmem:[#allocation2 + $0x8] sm:$0xff] %vm19_vm0, %v743_v5 }
   0x2   :  { %v675_v3 = vpack.c.bf16 %v69_v1, %v68_v0  ;;  %v71_v4 = vld [vmem:[%s939_s1 + $0x18] sm:$0xff]  ;;  %20 = vst.msk [vmem:[#allocation2] sm:$0xff] %vm19_vm0, %v743_v5  ;;  %22 = vst.msk [vmem:[#allocation2 + $0x10] sm:$0xff] %vm19_vm0, %v743_v5  ;;  %v72_v7 = vld [vmem:[%s939_s1 + $0x20] sm:$0xff] }
   0x3   :  { %23 = vst.msk [vmem:[#allocation2 + $0x18] sm:$0xff] %vm19_vm0, %v743_v5  ;;  %24 = vst.msk [vmem:[#allocation2 + $0x20] sm:$0xff] %vm19_vm0, %v743_v5  ;;  %v679_v6 = vpack.c.bf16 %v71_v4, %v70_v2  ;;  %v73_v8 = vld [vmem:[%s939_s1 + $0x28] sm:$0xff]  ;;  %v52_v10 = vld [vmem:[%s938_s0] sm:$0xff] }
   0x4   :  { %25 = vst.msk [vmem:[#allocation2 + $0x28] sm:$0xff] %vm19_vm0, %v743_v5  ;;  %26 = vst.msk [vmem:[#allocation2 + $0x30] sm:$0xff] %vm19_vm0, %v743_v5  ;;  %676 = vmatprep.subr.bf16.mxu0 %v675_v3  ;;  %v683_v9 = vpack.c.bf16 %v73_v8, %v72_v7  ;;  %v74_v11 = vld [vmem:[%s939_s1 + $0x30] sm:$0xff]  ;;  %v75_v12 = vld [vmem:[%s939_s1 + $0x38] sm:$0xff]  ;;  %617 = vmatprep.mubr.f32.mxu0 %v52_v10 }
   0x5   :  { %27 = vst.msk [vmem:[#allocation2 + $0x38] sm:$0xff] %vm19_vm0, %v743_v5  ;;  %28 = vst.msk [vmem:[#allocation2 + $0x40] sm:$0xff] %vm19_vm0, %v743_v5  ;;  %678 = vmatpush3.bf16.msra.mxu0 %v675_v3  ;;  %v687_v13 = vpack.c.bf16 %v75_v12, %v74_v11  ;;  %v76_v14 = vld [vmem:[%s939_s1 + $0x40] sm:$0xff]  ;;  %v77_v15 = vld [vmem:[%s939_s1 + $0x48] sm:$0xff] }
   0x6   :  { %29 = vst.msk [vmem:[#allocation2 + $0x48] sm:$0xff] %vm19_vm0, %v743_v5  ;;  %30 = vst.msk [vmem:[#allocation2 + $0x50] sm:$0xff] %vm19_vm0, %v743_v5  ;;  %680 = vmatprep.subr.bf16.mxu0 %v679_v6 }
   0x7   :  { %31 = vst.msk [vmem:[#allocation2 + $0x58] sm:$0xff] %vm19_vm0, %v743_v5  ;;  %32 = vst.msk [vmem:[#allocation2 + $0x60] sm:$0xff] %vm19_vm0, %v743_v5 }
   0x8   :  { %33 = vst.msk [vmem:[#allocation2 + $0x68] sm:$0xff] %vm19_vm0, %v743_v5  ;;  %34 = vst.msk [vmem:[#allocation2 + $0x70] sm:$0xff] %vm19_vm0, %v743_v5 }
   0x9   :  { %35 = vst.msk [vmem:[#allocation2 + $0x78] sm:$0xff] %vm19_vm0, %v743_v5  ;;  %682 = vmatpush3.bf16.msra.mxu0 %v679_v6 }
   0xa   :  { %684 = vmatprep.subr.bf16.mxu0 %v683_v9 }
   0xb   :  { %8 = vsyncpa [#allocation4], 0  ;;  %v691_v16 = vpack.c.bf16 %v77_v15, %v76_v14  ;;  %v78_v17 = vld [vmem:[%s939_s1 + $0x50] sm:$0xff]  ;;  %v79_v18 = vld [vmem:[%s939_s1 + $0x58] sm:$0xff]  ;;  %vm334_vm1 = vcmask 1040384  }
   0xc   :  { %v695_v19 = vpack.c.bf16 %v79_v18, %v78_v17  ;;  %v80_v20 = vld [vmem:[%s939_s1 + $0x60] sm:$0xff]  ;;  %v81_v21 = vld [vmem:[%s939_s1 + $0x68] sm:$0xff]  ;;  %v82_v23 = vld [vmem:[%s939_s1 + $0x70] sm:$0xff] }
   0xd   :  { %686 = vmatpush3.bf16.msra.mxu0 %v683_v9  ;;  %v699_v22 = vpack.c.bf16 %v81_v21, %v80_v20  ;;  %v83_v24 = vld [vmem:[%s939_s1 + $0x78] sm:$0xff]  ;;  %v53_v26 = vld [vmem:[%s938_s0 + $0x8] sm:$0xff]  ;;  %v54_v27 = vld [vmem:[%s938_s0 + $0x10] sm:$0xff] }
   0xe   :  { %688 = vmatprep.subr.bf16.mxu0 %v687_v13  ;;  %v703_v25 = vpack.c.bf16 %v83_v24, %v82_v23  ;;  %v55_v28 = vld [vmem:[%s938_s0 + $0x18] sm:$0xff]  ;;  %v56_v29 = vld [vmem:[%s938_s0 + $0x20] sm:$0xff]  ;;  %v57_v30 = vld [vmem:[%s938_s0 + $0x28] sm:$0xff] }
   0xf   :  { %v58_v31 = vld [vmem:[%s938_s0 + $0x30] sm:$0xff]  ;;  %v59_v32 = vld [vmem:[%s938_s0 + $0x38] sm:$0xff]  ;;  %v60_v33 = vld [vmem:[%s938_s0 + $0x40] sm:$0xff] }
  0x10   :  { %v61_v34 = vld [vmem:[%s938_s0 + $0x48] sm:$0xff]  ;;  %v62_v35 = vld [vmem:[%s938_s0 + $0x50] sm:$0xff]  ;;  %v63_v36 = vld [vmem:[%s938_s0 + $0x58] sm:$0xff] }
  0x11   :  { %690 = vmatpush3.bf16.msra.mxu0 %v687_v13  ;;  %v64_v37 = vld [vmem:[%s938_s0 + $0x60] sm:$0xff]  ;;  %v65_v38 = vld [vmem:[%s938_s0 + $0x68] sm:$0xff]  ;;  %v66_v39 = vld [vmem:[%s938_s0 + $0x70] sm:$0xff] }
  0x12   :  { %692 = vmatprep.subr.bf16.mxu0 %v691_v16  ;;  %v67_v40 = vld [vmem:[%s938_s0 + $0x78] sm:$0xff]  ;;  %v281_v41 = vld [vmem:[%s940_s2] sm:$0xff]  ;;  %v282_v42 = vld [vmem:[%s940_s2 + $0x8] sm:$0xff] }
  0x13   :  { %v707_v43 = vpack.c.bf16 %v282_v42, %v281_v41  ;;  %v283_v44 = vld [vmem:[%s940_s2 + $0x10] sm:$0xff]  ;;  %v284_v45 = vld [vmem:[%s940_s2 + $0x18] sm:$0xff]  ;;  %v285_v47 = vld [vmem:[%s940_s2 + $0x20] sm:$0x1]  ;;  %s744_s2 = smov [#allocation3]  }
  0x14   :  { %v711_v46 = vpack.c.bf16 %v284_v45, %v283_v44  ;;  %v37_v48 = vld [vmem:[#allocation2 + $0x8] sm:$0xff]  ;;  %v36_v49 = vld [vmem:[#allocation2] sm:$0xff]  ;;  %v39_v54 = vld [vmem:[#allocation2 + $0x18] sm:$0xff]  ;;  %s504_s29 = sshll.u32 %s744_s2, 4  ;;  %s505_s29 = int_to_ptr.vmem [resolvable:$true] %s504_s29 }
  0x15   :  { %694 = vmatpush3.bf16.msra.mxu0 %v691_v16  ;;  %708 = vmatprep.subr.bf16.mxu1 %v707_v43  ;;  %v38_v55 = vld [vmem:[#allocation2 + $0x10] sm:$0xff]  ;;  %v41_v60 = vld [vmem:[#allocation2 + $0x28] sm:$0xff]  ;;  %v40_v61 = vld [vmem:[#allocation2 + $0x20] sm:$0xff]  ;;  %s719_s30 = scalar_lea.vmem %s505_s29, 2048  ;;  %p724_p1 = scmp.lt.s32.totalorder %s505_s29, %s505_s29 }
  0x16   :  { %696 = vmatprep.subr.bf16.mxu0 %v695_v19  ;;  %710 = vmatpush3.bf16.msra.mxu1 %v707_v43  ;;  %v43_v2 = vld [vmem:[#allocation2 + $0x38] sm:$0xff]  ;;  %v42_v4 = vld [vmem:[#allocation2 + $0x30] sm:$0xff]  ;;  %v45_v10 = vld [vmem:[#allocation2 + $0x48] sm:$0xff]  ;;  %p720_p0 = scmp.ne.s32.totalorder %s505_s29, %s719_s30  ;;  %p725_p2 = scmp.lt.s32.totalorder %s719_s30, %s719_s30 }
  0x17   :  { %712 = vmatprep.subr.bf16.mxu1 %v711_v46  ;;  %v44_v12 = vld [vmem:[#allocation2 + $0x40] sm:$0xff]  ;;  %v47_v18 = vld [vmem:[#allocation2 + $0x58] sm:$0xff]  ;;  %v46_v20 = vld [vmem:[#allocation2 + $0x50] sm:$0xff] }
  0x18   :  { %p726_p3 = por %p725_p2, %p724_p1 }
  0x19   :  { %698 = vmatpush3.bf16.msra.mxu0 %v695_v19 }
  0x1a   :  { %700 = vmatprep.subr.bf16.mxu0 %v699_v22  ;;  %714 = vmatpush3.bf16.msra.mxu1 %v711_v46  ;;  %p727_p4 = pnand %p726_p3, %p720_p0 }
  0x1b   :  { %649 = vmatprep.subr.msk.mxu1 %vm334_vm1, %v285_v47 }
  0x1d   :  { %702 = vmatpush3.bf16.msra.mxu0 %v699_v22 }
  0x1e   :  { %704 = vmatprep.subr.bf16.mxu0 %v703_v25  ;;  %650 = vmatpush3.msk.msra.mxu1 %vm334_vm1, %v285_v47 }
  0x21   :  { %706 = vmatpush3.bf16.msra.mxu0 %v703_v25 }
  0x24   :  { %618 = vmatmul.mubr.f32.vlgmr.msra.gmra.mrb[0].mxu0 %v53_v26  ;;  %v49_v26 = vld [vmem:[#allocation2 + $0x68] sm:$0xff] }
  0x25   :  { %620 = vmatprep.mubr.f32.mxu0 %v54_v27 }
  0x28   :  { %621 = vmatmul.mubr.f32.gmra.mrb[2].mxu0 %v55_v28  ;;  %v48_v28 = vld [vmem:[#allocation2 + $0x60] sm:$0xff] }
  0x29   :  { %623 = vmatprep.mubr.f32.mxu0 %v56_v29 }
  0x2c   :  { %624 = vmatmul.mubr.f32.gmra.mrb[4].mxu0 %v57_v30 }
  0x2d   :  { %626 = vmatprep.mubr.f32.mxu0 %v58_v31 }
  0x30   :  { %627 = vmatmul.mubr.f32.gmra.mrb[6].mxu0 %v59_v32 }
  0x31   :  { %629 = vmatprep.mubr.f32.mxu0 %v60_v33 }
  0x34   :  { %630 = vmatmul.mubr.f32.gmra.mrb[8].mxu0 %v61_v34  ;;  %v51_v34 = vld [vmem:[#allocation2 + $0x78] sm:$0xff] }
  0x35   :  { %632 = vmatprep.mubr.f32.mxu0 %v62_v35 }
  0x38   :  { %633 = vmatmul.mubr.f32.gmra.mrb[10].mxu0 %v63_v36  ;;  %v50_v36 = vld [vmem:[#allocation2 + $0x70] sm:$0xff] }
  0x39   :  { %635 = vmatprep.mubr.f32.mxu0 %v64_v37 }
  0x3c   :  { %636 = vmatmul.mubr.f32.gmra.mrb[12].mxu0 %v65_v38 }
  0x3d   :  { %638 = vmatprep.mubr.f32.mxu0 %v66_v39 }
  0x40   :  { %639 = vmatmul.mubr.f32.gmra.mrb[14].mxu0 %v67_v40 }
  0xf7   :  { %v619_v50 = vpop.f32.mrb[0].mxu0 }
  0xf8   :  { %v230_v51 = vadd.f32 %v619_v50, %v37_v48  ;;  %v150_v52 = vpop.f32.mrb[1].mxu0 }
  0xf9   :  { %v229_v53 = vadd.f32 %v150_v52, %v36_v49 }
  0xfa   :  { %247 = vst.msk [vmem:[#allocation2 + $0x8] sm:$0xff] %vm19_vm0, %v230_v51 }
  0xfb   :  { %246 = vst.msk [vmem:[#allocation2] sm:$0xff] %vm19_vm0, %v229_v53  ;;  %v622_v56 = vpop.f32.mrb[2].mxu0 }
  0xfc   :  { %v232_v57 = vadd.f32 %v622_v56, %v39_v54  ;;  %v160_v58 = vpop.f32.mrb[3].mxu0 }
  0xfd   :  { %v231_v59 = vadd.f32 %v160_v58, %v38_v55 }
  0xfe   :  { %249 = vst.msk [vmem:[#allocation2 + $0x18] sm:$0xff] %vm19_vm0, %v232_v57 }
  0xff   :  { %248 = vst.msk [vmem:[#allocation2 + $0x10] sm:$0xff] %vm19_vm0, %v231_v59  ;;  %v625_v62 = vpop.f32.mrb[4].mxu0 }
 0x100   :  { %v234_v63 = vadd.f32 %v625_v62, %v41_v60  ;;  %v170_v0 = vpop.f32.mrb[5].mxu0 }
 0x101   :  { %v233_v1 = vadd.f32 %v170_v0, %v40_v61  ;;  %v266_v6 = vld [vmem:[#allocation2 + $0x8] sm:$0xff] }
 0x102   :  { %251 = vst.msk [vmem:[#allocation2 + $0x28] sm:$0xff] %vm19_vm0, %v234_v63  ;;  %v265_v3 = vld [vmem:[#allocation2] sm:$0xff] }
 0x103   :  { %250 = vst.msk [vmem:[#allocation2 + $0x20] sm:$0xff] %vm19_vm0, %v233_v1  ;;  %v628_v5 = vpop.f32.mrb[6].mxu0  ;;  %651 = vmatprep.mubr.msk.f32.mxu1 %vm19_vm0, %v265_v3 }
 0x104   :  { %v236_v7 = vadd.f32 %v628_v5, %v43_v2  ;;  %v180_v8 = vpop.f32.mrb[7].mxu0  ;;  %652 = vmatmul.mubr.msk.f32.vlgmr.msra.gmra.mrb[0].mxu1 %vm19_vm0, %v266_v6 }
 0x105   :  { %v235_v9 = vadd.f32 %v180_v8, %v42_v4  ;;  %v268_v14 = vld [vmem:[#allocation2 + $0x18] sm:$0xff] }
 0x106   :  { %253 = vst.msk [vmem:[#allocation2 + $0x38] sm:$0xff] %vm19_vm0, %v236_v7  ;;  %v267_v11 = vld [vmem:[#allocation2 + $0x10] sm:$0xff] }
 0x107   :  { %252 = vst.msk [vmem:[#allocation2 + $0x30] sm:$0xff] %vm19_vm0, %v235_v9  ;;  %v631_v13 = vpop.f32.mrb[8].mxu0  ;;  %654 = vmatprep.mubr.msk.f32.mxu1 %vm19_vm0, %v267_v11 }
 0x108   :  { %v238_v15 = vadd.f32 %v631_v13, %v45_v10  ;;  %v190_v16 = vpop.f32.mrb[9].mxu0  ;;  %655 = vmatmul.mubr.msk.f32.gmra.mrb[2].mxu1 %vm19_vm0, %v268_v14 }
 0x109   :  { %v237_v17 = vadd.f32 %v190_v16, %v44_v12  ;;  %v270_v22 = vld [vmem:[#allocation2 + $0x28] sm:$0xff] }
 0x10a   :  { %255 = vst.msk [vmem:[#allocation2 + $0x48] sm:$0xff] %vm19_vm0, %v238_v15  ;;  %v269_v19 = vld [vmem:[#allocation2 + $0x20] sm:$0xff] }
 0x10b   :  { %254 = vst.msk [vmem:[#allocation2 + $0x40] sm:$0xff] %vm19_vm0, %v237_v17  ;;  %v634_v21 = vpop.f32.mrb[10].mxu0  ;;  %657 = vmatprep.mubr.msk.f32.mxu1 %vm19_vm0, %v269_v19 }
 0x10c   :  { %v240_v23 = vadd.f32 %v634_v21, %v47_v18  ;;  %v200_v24 = vpop.f32.mrb[11].mxu0  ;;  %658 = vmatmul.mubr.msk.f32.gmra.mrb[4].mxu1 %vm19_vm0, %v270_v22 }
 0x10d   :  { %v239_v25 = vadd.f32 %v200_v24, %v46_v20  ;;  %v272_v30 = vld [vmem:[#allocation2 + $0x38] sm:$0xff] }
 0x10e   :  { %257 = vst.msk [vmem:[#allocation2 + $0x58] sm:$0xff] %vm19_vm0, %v240_v23  ;;  %v271_v27 = vld [vmem:[#allocation2 + $0x30] sm:$0xff] }
 0x10f   :  { %256 = vst.msk [vmem:[#allocation2 + $0x50] sm:$0xff] %vm19_vm0, %v239_v25  ;;  %v637_v29 = vpop.f32.mrb[12].mxu0  ;;  %660 = vmatprep.mubr.msk.f32.mxu1 %vm19_vm0, %v271_v27 }
 0x110   :  { %v242_v31 = vadd.f32 %v637_v29, %v49_v26  ;;  %v210_v32 = vpop.f32.mrb[13].mxu0  ;;  %661 = vmatmul.mubr.msk.f32.gmra.mrb[6].mxu1 %vm19_vm0, %v272_v30 }
 0x111   :  { %v241_v33 = vadd.f32 %v210_v32, %v48_v28  ;;  %v274_v38 = vld [vmem:[#allocation2 + $0x48] sm:$0xff] }
 0x112   :  { %259 = vst.msk [vmem:[#allocation2 + $0x68] sm:$0xff] %vm19_vm0, %v242_v31  ;;  %v273_v35 = vld [vmem:[#allocation2 + $0x40] sm:$0xff] }
 0x113   :  { %258 = vst.msk [vmem:[#allocation2 + $0x60] sm:$0xff] %vm19_vm0, %v241_v33  ;;  %v640_v37 = vpop.f32.mrb[14].mxu0  ;;  %663 = vmatprep.mubr.msk.f32.mxu1 %vm19_vm0, %v273_v35 }
 0x114   :  { %v244_v39 = vadd.f32 %v640_v37, %v51_v34  ;;  %v220_v40 = vpop.f32.mrb[15].mxu0  ;;  %664 = vmatmul.mubr.msk.f32.gmra.mrb[8].mxu1 %vm19_vm0, %v274_v38 }
 0x115   :  { %v243_v41 = vadd.f32 %v220_v40, %v50_v36  ;;  %v276_v43 = vld [vmem:[#allocation2 + $0x58] sm:$0xff] }
 0x116   :  { %261 = vst.msk [vmem:[#allocation2 + $0x78] sm:$0xff] %vm19_vm0, %v244_v39  ;;  %v275_v42 = vld [vmem:[#allocation2 + $0x50] sm:$0xff] }
 0x117   :  { %260 = vst.msk [vmem:[#allocation2 + $0x70] sm:$0xff] %vm19_vm0, %v243_v41  ;;  %666 = vmatprep.mubr.msk.f32.mxu1 %vm19_vm0, %v275_v42 }
 0x118   :  { %667 = vmatmul.mubr.msk.f32.gmra.mrb[10].mxu1 %vm19_vm0, %v276_v43 }
 0x119   :  { %v278_v45 = vld [vmem:[#allocation2 + $0x68] sm:$0xff] }
 0x11a   :  { %v277_v44 = vld [vmem:[#allocation2 + $0x60] sm:$0xff] }
 0x11b   :  { %669 = vmatprep.mubr.msk.f32.mxu1 %vm19_vm0, %v277_v44 }
 0x11c   :  { %670 = vmatmul.mubr.msk.f32.gmra.mrb[12].mxu1 %vm19_vm0, %v278_v45 }
 0x11d   :  { %v280_v47 = vld [vmem:[#allocation2 + $0x78] sm:$0xff] }
 0x11e   :  { %v279_v46 = vld [vmem:[#allocation2 + $0x70] sm:$0xff] }
 0x11f   :  { %672 = vmatprep.mubr.msk.f32.mxu1 %vm19_vm0, %v279_v46 }
 0x120   :  { %673 = vmatmul.mubr.msk.f32.gmra.mrb[14].mxu1 %vm19_vm0, %v280_v47 }
 0x1d7   :  { %v653_v48 = vpop.f32.mrb[0].mxu1 }
 0x1d8   :  { %484 = vst [vmem:[#allocation3 + $0x8] sm:$0xff] %v653_v48  ;;  %v404_v49 = vpop.f32.mrb[1].mxu1 }
 0x1d9   :  { %483 = vst [vmem:[#allocation3] sm:$0xff] %v404_v49 }
 0x1db   :  { %v656_v50 = vpop.f32.mrb[2].mxu1 }
 0x1dc   :  { %486 = vst [vmem:[#allocation3 + $0x18] sm:$0xff] %v656_v50  ;;  %v414_v51 = vpop.f32.mrb[3].mxu1 }
 0x1dd   :  { %485 = vst [vmem:[#allocation3 + $0x10] sm:$0xff] %v414_v51 }
 0x1df   :  { %v659_v52 = vpop.f32.mrb[4].mxu1 }
 0x1e0   :  { %488 = vst [vmem:[#allocation3 + $0x28] sm:$0xff] %v659_v52  ;;  %v424_v53 = vpop.f32.mrb[5].mxu1 }
 0x1e1   :  { %487 = vst [vmem:[#allocation3 + $0x20] sm:$0xff] %v424_v53 }
 0x1e3   :  { %v662_v54 = vpop.f32.mrb[6].mxu1 }
 0x1e4   :  { %490 = vst [vmem:[#allocation3 + $0x38] sm:$0xff] %v662_v54  ;;  %v434_v55 = vpop.f32.mrb[7].mxu1 }
 0x1e5   :  { %489 = vst [vmem:[#allocation3 + $0x30] sm:$0xff] %v434_v55 }
 0x1e7   :  { %v665_v56 = vpop.f32.mrb[8].mxu1 }
 0x1e8   :  { %492 = vst [vmem:[#allocation3 + $0x48] sm:$0xff] %v665_v56  ;;  %v444_v57 = vpop.f32.mrb[9].mxu1 }
 0x1e9   :  { %491 = vst [vmem:[#allocation3 + $0x40] sm:$0xff] %v444_v57 }
 0x1eb   :  { %v668_v58 = vpop.f32.mrb[10].mxu1 }
 0x1ec   :  { %494 = vst [vmem:[#allocation3 + $0x58] sm:$0xff] %v668_v58  ;;  %v454_v59 = vpop.f32.mrb[11].mxu1 }
 0x1ed   :  { %493 = vst [vmem:[#allocation3 + $0x50] sm:$0xff] %v454_v59 }
 0x1ef   :  { %v671_v60 = vpop.f32.mrb[12].mxu1 }
 0x1f0   :  { %496 = vst [vmem:[#allocation3 + $0x68] sm:$0xff] %v671_v60  ;;  %v464_v61 = vpop.f32.mrb[13].mxu1 }
 0x1f1   :  { %495 = vst [vmem:[#allocation3 + $0x60] sm:$0xff] %v464_v61 }
 0x1f3   :  { %v674_v62 = vpop.f32.mrb[14].mxu1 }
 0x1f4   :  { %498 = vst [vmem:[#allocation3 + $0x78] sm:$0xff] %v674_v62  ;;  %v474_v63 = vpop.f32.mrb[15].mxu1 }
 0x1f5   :  { %497 = vst [vmem:[#allocation3 + $0x70] sm:$0xff] %v474_v63 }
 0x1f6   :  { %730 = shalt.err (!%p727_p4)
}
 0x1f7   :  { %s731_s6 = scalar_lea.hbm %s941_s3, 2048 }
 0x1f8   :  { %p732_p5 = scmp.ne.s32.totalorder %s941_s3, %s731_s6  ;;  %p735_p6 = scmp.lt.u32.totalorder %s731_s6, %s941_s3 }
 0x1fa   :  { %p737_p7 = pnand %p735_p6, %p732_p5 }
 0x1fc   :  { %740 = shalt.err (!%p737_p7)
}
 0x1fd   :  { %s745_s11 = smov 128   ;;  %s746_s12 = smov 8  }
 0x1fe   :  { %510 = dma.vmem_to_hbm [thread:$0]  %s505_s29, 2048, %s941_s3, [#allocation4], %s745_s11, %s745_s11, %s746_s12  }
 0x1ff   :  { %741 = dma.done.wait [#allocation4], 2048  }
 0x200   :  { %742 = vsyncadd [#allocation4], 4294965248 }
 0x201   :  { %514 = vsyncpa [#allocation4], 1 }

</bundles_post_ra>
